<compile_context>
chip_gen: v6e
topology: v6e:2x2x1
jax: 0.10.0
libtpu: 0.0.40
codegen_flags: <defaults>
</compile_context>

<pallas_src>
import jax
import jax.numpy as jnp
from jax.experimental import pallas as pl
from jax.experimental.pallas import tpu as pltpu


def _round_up(x, m):
    return ((x + m - 1) // m) * m


def _av_fused_kernel(v_ref, a_ref, w_ref, b_ref, out_ref):
    """Fused GAP + projection for BOTH branches: one dot, one full-width store.

    v_ref  : (TB, Cv, Sv) f32    video tile (spatial flattened to last axis)
    a_ref  : (TB, Ca, Sa) f32    audio tile
    w_ref  : (Cv+Ca, 2*Ppad) bf16  block-diagonal fused weight (1/S folded in)
    b_ref  : (1, 2*Ppad)   f32   fused bias row [video | audio]
    out_ref: (TB, 2*Ppad)  f32   lane-dense output slab [video | audio]
    """
    # GAP as an in-kernel cross-lane (XLU) sum; the 1/S scale lives in the weight.
    pv = jnp.sum(v_ref[...], axis=-1)                                 # (TB, Cv) f32
    pa = jnp.sum(a_ref[...], axis=-1)                                 # (TB, Ca) f32
    # Concatenate pooled features along K and cast to bf16 (native MXU dtype).
    x = jnp.concatenate([pv, pa], axis=-1).astype(jnp.bfloat16)       # (TB, Cv+Ca)
    # Single dot: N = 2*Ppad = 256 feeds the full MXU width on v6e/v7x;
    # f32 accumulation, f32 bias added after the dot.
    y = jnp.dot(x, w_ref[...], preferred_element_type=jnp.float32)    # (TB, 2*Ppad)
    out_ref[...] = (y + b_ref[...]).astype(out_ref.dtype)


def av_fused_forward(v3, a3, w_fused, b_fused, tb):
    """Gridded pallas_call: tile over batch, weights/bias resident across the grid."""
    b_pad, cv, sv = v3.shape
    _, ca, sa = a3.shape
    k, n2 = w_fused.shape
    grid = (b_pad // tb,)
    return pl.pallas_call(
        _av_fused_kernel,
        out_shape=jax.ShapeDtypeStruct((b_pad, n2), jnp.float32),
        grid_spec=pltpu.PrefetchScalarGridSpec(
            num_scalar_prefetch=0,
            grid=grid,
            in_specs=[
                pl.BlockSpec((tb, cv, sv), lambda i: (i, 0, 0)),   # video tile
                pl.BlockSpec((tb, ca, sa), lambda i: (i, 0, 0)),   # audio tile
                pl.BlockSpec((k, n2), lambda i: (0, 0)),           # compact fused weight
                pl.BlockSpec((1, n2), lambda i: (0, 0)),           # fused bias
            ],
            out_specs=pl.BlockSpec((tb, n2), lambda i: (i, 0)),
        ),
        compiler_params=pltpu.CompilerParams(
            # Batch axis is independent -> shard across v7x's two TensorCores.
            dimension_semantics=("parallel",),
            # Sized against v7x's 64 MiB VMEM (blocks here are tiny anyway).
            vmem_limit_bytes=32 * 1024 * 1024,
        ),
    )(v3, a3, w_fused, b_fused)


class AVWrapperPallas:
    """JAX/Pallas analogue of AV_Wrapper with synthetic (linear) backbones."""

    def __init__(self, key, video_in_ch, audio_in_ch,
                 video_out_dim, audio_out_dim,
                 video_spatial, audio_spatial, proj_dim=32):
        ks = jax.random.split(key, 8)
        s = 0.02
        # Raw parameters (PyTorch parameterization) -- kept for the reference path.
        self.v_w_bb = s * jax.random.normal(ks[0], (video_in_ch, video_out_dim), jnp.float32)
        self.v_b_bb = s * jax.random.normal(ks[1], (1, video_out_dim), jnp.float32)
        self.a_w_bb = s * jax.random.normal(ks[2], (audio_in_ch, audio_out_dim), jnp.float32)
        self.a_b_bb = s * jax.random.normal(ks[3], (1, audio_out_dim), jnp.float32)
        # Head = nn.Linear(out_dim, proj_dim); PyTorch weight shape (proj_dim, out_dim)
        self.v_w_proj = s * jax.random.normal(ks[4], (proj_dim, video_out_dim), jnp.float32)
        self.v_b_proj = s * jax.random.normal(ks[5], (1, proj_dim), jnp.float32)
        self.a_w_proj = s * jax.random.normal(ks[6], (proj_dim, audio_out_dim), jnp.float32)
        self.a_b_proj = s * jax.random.normal(ks[7], (1, proj_dim), jnp.float32)
        self.out_dim = proj_dim
        self.cv = video_in_ch
        self.ca = audio_in_ch

        # ---- Host-side precompute (done once, not per forward) ----
        # Per-branch lane-dense width; 2*Ppad = 256 total output columns.
        self.proj_pad = _round_up(proj_dim, 128)
        ppad = self.proj_pad

        # Collapse backbone Linear + Head Linear; fold 1/S of the spatial mean in.
        # NO spatial expansion: weight stays compact at K = C.
        wv_fused = (self.v_w_bb @ self.v_w_proj.T) / float(video_spatial)   # (Cv, P)
        wa_fused = (self.a_w_bb @ self.a_w_proj.T) / float(audio_spatial)   # (Ca, P)

        # Block-diagonal fused weight: video rows feed cols [0, P), audio rows
        # feed cols [Ppad, Ppad+P); cast to bf16 (native MXU dtype on v5e/v6e/v7x).
        w = jnp.zeros((video_in_ch + audio_in_ch, 2 * ppad), jnp.float32)
        w = w.at[:video_in_ch, :proj_dim].set(wv_fused)
        w = w.at[video_in_ch:, ppad:ppad + proj_dim].set(wa_fused)
        self.w_fused = w.astype(jnp.bfloat16)                               # (Cv+Ca, 2*Ppad)

        bv_fused = self.v_b_bb @ self.v_w_proj.T + self.v_b_proj            # (1, P)
        ba_fused = self.a_b_bb @ self.a_w_proj.T + self.a_b_proj            # (1, P)
        b = jnp.zeros((1, 2 * ppad), jnp.float32)
        b = b.at[:, :proj_dim].set(bv_fused)
        b = b.at[:, ppad:ppad + proj_dim].set(ba_fused)
        self.b_fused = b                                                    # f32, exact

    def __call__(self, video, audio):
        # video: (B, Cv, H, W)   audio: (B, Ca, F, T)   (NCHW)
        b = video.shape[0]
        v3 = video.reshape(b, self.cv, -1)      # (B, Cv, Sv)
        a3 = audio.reshape(b, self.ca, -1)      # (B, Ca, Sa)

        # Pad B to a sublane-friendly batch tile (unmasked vld/vst, clean layout).
        tb = min(128, _round_up(b, 8))
        b_pad = _round_up(b, tb)
        if b_pad != b:
            v3 = jnp.pad(v3, ((0, b_pad - b), (0, 0), (0, 0)))
            a3 = jnp.pad(a3, ((0, b_pad - b), (0, 0), (0, 0)))

        out = av_fused_forward(v3, a3, self.w_fused, self.b_fused, tb)
        video_emb = out[:b, :self.out_dim]
        audio_emb = out[:b, self.proj_pad:self.proj_pad + self.out_dim]
        return video_emb, audio_emb


def _reference(model, video, audio):
    """Pure-JAX f32 reference: GAP -> backbone Linear -> Head Linear (two steps)."""
    v = video.reshape(video.shape[0], video.shape[1], -1).mean(-1)
    a = audio.reshape(audio.shape[0], audio.shape[1], -1).mean(-1)
    v_emb = v @ model.v_w_bb + model.v_b_bb
    a_emb = a @ model.a_w_bb + model.a_b_bb
    v_out = v_emb @ model.v_w_proj.T + model.v_b_proj
    a_out = a_emb @ model.a_w_proj.T + model.a_b_proj
    return v_out, a_out


if __name__ == "__main__":
    key = jax.random.PRNGKey(0)
    k_v, k_a, k_p = jax.random.split(key, 3)

    B = 2
    video = jax.random.normal(k_v, (B, 4, 16, 16), jnp.float32)   # NCHW -> Sv = 256
    audio = jax.random.normal(k_a, (B, 4, 8, 8), jnp.float32)     # NCHW -> Sa = 64

    model = AVWrapperPallas(k_p, video_in_ch=4, audio_in_ch=4,
                            video_out_dim=24, audio_out_dim=16,
                            video_spatial=16 * 16, audio_spatial=8 * 8,
                            proj_dim=32)

    video_emb, audio_emb = model(video, audio)
    jax.block_until_ready((video_emb, audio_emb))

    v_ref, a_ref = _reference(model, video, audio)
    assert video_emb.shape == (B, 32) and audio_emb.shape == (B, 32)
    # bf16 weights / activations in the kernel (f32 accumulation, f32 bias):
    # tolerance loosened vs the pure-f32 path.
    assert jnp.allclose(video_emb, v_ref, atol=1e-3, rtol=1e-2)
    assert jnp.allclose(audio_emb, a_ref, atol=1e-3, rtol=1e-2)

    print("KERNEL_OK")
</pallas_src>

<mosaic_0001>
module attributes {stable_mosaic.version = 11 : i64} {
  func.func @_av_fused_kernel(%arg0: i32, %arg1: memref<8x4x256xf32, #tpu.memory_space<vmem>>, %arg2: memref<8x4x64xf32, #tpu.memory_space<vmem>>, %arg3: memref<8x256xbf16, #tpu.memory_space<vmem>>, %arg4: memref<1x256xf32, #tpu.memory_space<vmem>>, %arg5: memref<8x256xf32, #tpu.memory_space<vmem>>) attributes {dimension_semantics = [#tpu.dimension_semantics<parallel>], iteration_bounds = array<i64: 1>, scalar_prefetch = 0 : i64, scratch_operands = 0 : i64, tpu.core_type = #tpu.core_type<tc>, window_params = [{transform_indices = @transform_0, window_bounds = array<i64: 8, 4, 256>}, {transform_indices = @transform_1, window_bounds = array<i64: 8, 4, 64>}, {pipeline_mode = #tpu.pipeline_mode<synchronous>, transform_indices = @transform_2, window_bounds = array<i64: 8, 256>}, {pipeline_mode = #tpu.pipeline_mode<synchronous>, transform_indices = @transform_3, window_bounds = array<i64: 1, 256>}, {transform_indices = @transform_4, window_bounds = array<i64: 8, 256>}]} {
    %c0 = arith.constant 0 : index
    %c0_0 = arith.constant 0 : index
    %c0_1 = arith.constant 0 : index
    %0 = vector.load %arg1[%c0, %c0_0, %c0_1] : memref<8x4x256xf32, #tpu.memory_space<vmem>>, vector<8x4x256xf32>
    %cst = arith.constant dense<0.000000e+00> : vector<8x4xf32>
    %1 = vector.multi_reduction <add>, %0, %cst [2] : vector<8x4x256xf32> to vector<8x4xf32>
    %c0_2 = arith.constant 0 : index
    %c0_3 = arith.constant 0 : index
    %c0_4 = arith.constant 0 : index
    %2 = vector.load %arg2[%c0_2, %c0_3, %c0_4] : memref<8x4x64xf32, #tpu.memory_space<vmem>>, vector<8x4x64xf32>
    %cst_5 = arith.constant dense<0.000000e+00> : vector<8x4xf32>
    %3 = vector.multi_reduction <add>, %2, %cst_5 [2] : vector<8x4x64xf32> to vector<8x4xf32>
    %4 = tpu.concatenate %1, %3 in 1 : vector<8x4xf32>, vector<8x4xf32> -> vector<8x8xf32>
    %5 = arith.truncf %4 : vector<8x8xf32> to vector<8x8xbf16>
    %c0_6 = arith.constant 0 : index
    %c0_7 = arith.constant 0 : index
    %6 = vector.load %arg3[%c0_6, %c0_7] : memref<8x256xbf16, #tpu.memory_space<vmem>>, vector<8x256xbf16>
    %cst_8 = arith.constant dense<0.000000e+00> : vector<8x256xf32>
    %7 = tpu.matmul %5, %6, %cst_8 {dimension_numbers = #tpu.dot_dimension_numbers<[1], [0], [0], [1], [0, 0, 1, 1], [], []>} : vector<8x8xbf16>, vector<8x256xbf16>, vector<8x256xf32> -> vector<8x256xf32>
    %c0_9 = arith.constant 0 : index
    %c0_10 = arith.constant 0 : index
    %8 = vector.load %arg4[%c0_9, %c0_10] : memref<1x256xf32, #tpu.memory_space<vmem>>, vector<1x256xf32>
    %9 = vector.broadcast %8 : vector<1x256xf32> to vector<8x256xf32>
    %10 = arith.addf %7, %9 : vector<8x256xf32>
    %c0_11 = arith.constant 0 : index
    %c0_12 = arith.constant 0 : index
    %11 = vector.load %arg5[%c0_11, %c0_12] : memref<8x256xf32, #tpu.memory_space<vmem>>, vector<8x256xf32>
    tpu.vector_store %arg5[%c0_11, %c0_12], %10 {strides = array<i32>} : memref<8x256xf32, #tpu.memory_space<vmem>>, vector<8x256xf32>,
    return
  }
  func.func @transform_0(%arg0: i32) -> (i32, i32, i32) {
    %c0_i32 = arith.constant 0 : i32
    %c0_i32_0 = arith.constant 0 : i32
    %c0_i32_1 = arith.constant 0 : i32
    return %arg0, %c0_i32, %c0_i32_0 : i32, i32, i32
  }
  func.func @transform_1(%arg0: i32) -> (i32, i32, i32) {
    %c0_i32 = arith.constant 0 : i32
    %c0_i32_0 = arith.constant 0 : i32
    %c0_i32_1 = arith.constant 0 : i32
    return %arg0, %c0_i32, %c0_i32_0 : i32, i32, i32
  }
  func.func @transform_2(%arg0: i32) -> (i32, i32) {
    %c0_i32 = arith.constant 0 : i32
    %c0_i32_0 = arith.constant 0 : i32
    %c0_i32_1 = arith.constant 0 : i32
    return %c0_i32, %c0_i32_0 : i32, i32
  }
  func.func @transform_3(%arg0: i32) -> (i32, i32) {
    %c0_i32 = arith.constant 0 : i32
    %c0_i32_0 = arith.constant 0 : i32
    %c0_i32_1 = arith.constant 0 : i32
    return %c0_i32, %c0_i32_0 : i32, i32
  }
  func.func @transform_4(%arg0: i32) -> (i32, i32) {
    %c0_i32 = arith.constant 0 : i32
    %c0_i32_0 = arith.constant 0 : i32
    return %arg0, %c0_i32 : i32, i32
  }
}

</mosaic_0001>

<bundles_post_ra>
// kernel: tpu_custom_call.1
= control target key start
LH: loop header
LB: loop body
LE: loop exit
PB: predicated region body
PF: predicated region fallthrough
CT: control target
= control target key end

     0   :  { %9 = vsyncpa [#allocation3], 0  ;;  %s552_s0 = inlined_call_operand.hbm [shape: f32[8,4,256], index: 0, kind: input, shape index: {}]   ;;  %s553_s1 = inlined_call_operand.hbm [shape: f32[8,4,64], index: 1, kind: input, shape index: {}]   ;;  %s554_s2 = inlined_call_operand.hbm [shape: bf16[8,256], index: 2, kind: input, shape index: {}]   ;;  %s555_s3 = inlined_call_operand.vmem [shape: f32[1,256], index: 3, kind: input, shape index: {}]   ;;  %s556_s4 = inlined_call_operand.hbm [shape: f32[8,256], index: 4, kind: output, shape index: {}]  }
   0x1   :  { %10 = vsyncpa [#allocation6], 0 }
   0x2   :  { %11 = vsyncpa [#allocation4], 0  ;;  %s469_s15 = smov [#allocation5]  }
   0x3   :  { %s29_s16 = sshll.u32 %s469_s15, 4  ;;  %s30_s16 = int_to_ptr.vmem [resolvable:$true] %s29_s16 }
   0x4   :  { %s391_s17 = scalar_lea.vmem %s30_s16, 512  ;;  %p396_p1 = scmp.lt.s32.totalorder %s30_s16, %s30_s16 }
   0x5   :  { %p392_p0 = scmp.ne.s32.totalorder %s30_s16, %s391_s17  ;;  %p397_p2 = scmp.lt.s32.totalorder %s391_s17, %s391_s17 }
   0x7   :  { %p398_p3 = por %p397_p2, %p396_p1 }
   0x9   :  { %p399_p4 = pnand %p398_p3, %p392_p0 }
   0xb   :  { %402 = shalt.err (!%p399_p4)
}
   0xc   :  { %s470_s18 = smov 64   ;;  %s471_s19 = smov 4  }
   0xd   :  { %35 = dma.hbm_to_vmem [thread:$0]  %s553_s1, 512, %s30_s16, [#allocation6], %s470_s18, %s470_s18, %s471_s19  }
   0xe   :  { %s472_s22 = smov [#allocation2]  }
   0xf   :  { %s17_s23 = sshll.u32 %s472_s22, 4  ;;  %s18_s23 = int_to_ptr.vmem [resolvable:$true] %s17_s23 }
  0x10   :  { %s411_s24 = scalar_lea.vmem %s18_s23, 1024  ;;  %p416_p6 = scmp.lt.s32.totalorder %s18_s23, %s18_s23 }
  0x11   :  { %p412_p5 = scmp.ne.s32.totalorder %s18_s23, %s411_s24  ;;  %p417_p7 = scmp.lt.s32.totalorder %s411_s24, %s411_s24 }
  0x13   :  { %p418_p8 = por %p417_p7, %p416_p6 }
  0x15   :  { %p419_p9 = pnand %p418_p8, %p412_p5 }
  0x17   :  { %422 = shalt.err (!%p419_p9)
}
  0x18   :  { %s473_s25 = smov 128   ;;  %s474_s26 = smov 8  }
  0x19   :  { %23 = dma.hbm_to_vmem [thread:$0]  %s552_s0, 1024, %s18_s23, [#allocation3], %s473_s25, %s473_s25, %s474_s26  }
  0x1a   :  { %s475_s29 = smov [#allocation7]  }
  0x1b   :  { %s42_s30 = sshll.u32 %s475_s29, 4  ;;  %s43_s30 = int_to_ptr.vmem [resolvable:$true] %s42_s30 }
  0x1c   :  { %s431_s1 = scalar_lea.vmem %s43_s30, 128  ;;  %p436_p11 = scmp.lt.s32.totalorder %s43_s30, %s43_s30 }
  0x1d   :  { %p432_p10 = scmp.ne.s32.totalorder %s43_s30, %s431_s1  ;;  %p437_p12 = scmp.lt.s32.totalorder %s431_s1, %s431_s1 }
  0x1f   :  { %p438_p13 = por %p437_p12, %p436_p11 }
  0x21   :  { %p439_p0 = pnand %p438_p13, %p432_p10 }
  0x23   :  { %442 = shalt.err (!%p439_p0)
}
  0x24   :  { %45 = dma.hbm_to_vmem [thread:$0]  %s554_s2, 128, %s43_s30, [#allocation6]  }
  0x25   :  { %463 = dma.done.wait [#allocation3], 1024  }
  0x26   :  { %464 = vsyncadd [#allocation3], 4294966272 }
  0x27   :  { %465 = dma.done.wait [#allocation6], 640  }
  0x28   :  { %466 = vsyncadd [#allocation6], 4294966656  ;;  %vm139_vm0 = vcmask 519168   ;;  %vm90_vm1 = vcmask 1043456   ;;  %v131_v0 = vld [vmem:[#allocation5] sm:$0xf] }
  0x29   :  { %v132_v1 = vld [vmem:[#allocation5 + $0x4] sm:$0xf]  ;;  %v140_v3 = vsel %vm139_vm0, %v131_v0, 0.0  ;;  %v59_v6 = vld [vmem:[#allocation2 + $0x8] sm:$0xff]  ;;  %v60_v8 = vld [vmem:[#allocation2 + $0x10] sm:$0xff]  ;;  %v476_v60 = vmov 0  }
  0x2a   :  { %v58_v2 = vld [vmem:[#allocation2] sm:$0xff]  ;;  %141 = vadd.xlane.f32.xlu1 %v140_v3  ;;  %v75_v7 = vcombine.high %v59_v6, %v59_v6  ;;  %v143_v9 = vsel %vm139_vm0, %v132_v1, 0.0  ;;  %v96_v11 = vsel %vm90_vm1, %v59_v6, 0.0  ;;  %v76_v12 = vcombine.high %v60_v8, %v60_v8  ;;  %v133_v14 = vld [vmem:[#allocation5 + $0x8] sm:$0xf]  ;;  %v61_v16 = vld [vmem:[#allocation2 + $0x18] sm:$0xff]  ;;  %333 = vmatprep.mubr.bf16.mxu0 %v476_v60 }
  0x2b   :  { %v74_v4 = vcombine.high %v58_v2, %v58_v2  ;;  %v91_v5 = vsel %vm90_vm1, %v58_v2, 0.0  ;;  %v146_v18 = vsel %vm139_vm0, %v133_v14, 0.0  ;;  %v101_v19 = vsel %vm90_vm1, %v60_v8, 0.0  ;;  %v134_v22 = vld [vmem:[#allocation5 + $0xc] sm:$0xf]  ;;  %v62_v23 = vld [vmem:[#allocation2 + $0x20] sm:$0xff] }
  0x2c   :  { %v97_v15 = vsel %vm90_vm1, %v75_v7, 0.0  ;;  %v102_v20 = vsel %vm90_vm1, %v76_v12, 0.0  ;;  %v77_v21 = vcombine.high %v61_v16, %v61_v16  ;;  %v149_v25 = vsel %vm139_vm0, %v134_v22, 0.0  ;;  %v135_v29 = vld [vmem:[#allocation5 + $0x10] sm:$0xf]  ;;  %v63_v30 = vld [vmem:[#allocation2 + $0x28] sm:$0xff] }
  0x2d   :  { %v92_v10 = vsel %vm90_vm1, %v74_v4, 0.0  ;;  %v98_v17 = vadd.f32 %v97_v15, %v96_v11  ;;  %v103_v24 = vadd.f32 %v102_v20, %v101_v19  ;;  %v106_v26 = vsel %vm90_vm1, %v61_v16, 0.0  ;;  %v136_v36 = vld [vmem:[#allocation5 + $0x14] sm:$0xf]  ;;  %v137_v43 = vld [vmem:[#allocation5 + $0x18] sm:$0xf] }
  0x2e   :  { %v93_v13 = vadd.f32 %v92_v10, %v91_v5  ;;  %144 = vadd.xlane.f32.xlu1 %v143_v9  ;;  %v107_v27 = vsel %vm90_vm1, %v77_v21, 0.0  ;;  %v78_v28 = vcombine.high %v62_v23, %v62_v23  ;;  %v152_v32 = vsel %vm139_vm0, %v135_v29, 0.0  ;;  %v64_v37 = vld [vmem:[#allocation2 + $0x30] sm:$0xff]  ;;  %v65_v44 = vld [vmem:[#allocation2 + $0x38] sm:$0xff]  ;;  %v273_v56 = vld [vmem:[#allocation7] sm:$0xff]  ;;  %s477_s7 = smov [#allocation8]  }
  0x2f   :  { %v108_v31 = vadd.f32 %v107_v27, %v106_v26  ;;  %v111_v33 = vsel %vm90_vm1, %v62_v23, 0.0  ;;  %v79_v35 = vcombine.high %v63_v30, %v63_v30  ;;  %v155_v39 = vsel %vm139_vm0, %v136_v36, 0.0  ;;  %v138_v50 = vld [vmem:[#allocation5 + $0x1c] sm:$0xf]  ;;  %s350_s8 = sshll.u32 %s477_s7, 4  ;;  %s351_s8 = int_to_ptr.vmem [resolvable:$true] %s350_s8 }
  0x30   :  { %94 = vadd.xlane.f32.xlu0 %v93_v13  ;;  %v112_v34 = vsel %vm90_vm1, %v78_v28, 0.0  ;;  %v116_v40 = vsel %vm90_vm1, %v63_v30, 0.0  ;;  %v80_v42 = vcombine.high %v64_v37, %v64_v37  ;;  %v158_v46 = vsel %vm139_vm0, %v137_v43, 0.0  ;;  %s443_s9 = scalar_lea.vmem %s351_s8, 256  ;;  %p448_p2 = scmp.lt.s32.totalorder %s351_s8, %s351_s8 }
  0x31   :  { %v113_v38 = vadd.f32 %v112_v34, %v111_v33  ;;  %v117_v41 = vsel %vm90_vm1, %v79_v35, 0.0  ;;  %v121_v47 = vsel %vm90_vm1, %v64_v37, 0.0  ;;  %v81_v49 = vcombine.high %v65_v44, %v65_v44  ;;  %p444_p1 = scmp.ne.s32.totalorder %s351_s8, %s443_s9  ;;  %p449_p3 = scmp.lt.s32.totalorder %s443_s9, %s443_s9 }
  0x32   :  { %147 = vadd.xlane.f32.xlu1 %v146_v18  ;;  %v118_v45 = vadd.f32 %v117_v41, %v116_v40  ;;  %v122_v48 = vsel %vm90_vm1, %v80_v42, 0.0  ;;  %v161_v52 = vsel %vm139_vm0, %v138_v50, 0.0  ;;  %v126_v53 = vsel %vm90_vm1, %v65_v44, 0.0 }
  0x33   :  { %v123_v51 = vadd.f32 %v122_v48, %v121_v47  ;;  %v127_v54 = vsel %vm90_vm1, %v81_v49, 0.0  ;;  %v361_v57 = vcombine.high %v273_v56, %v273_v56  ;;  %v360_v58 = vcombine.low %v273_v56, %v273_v56  ;;  %p450_p4 = por %p449_p3, %p448_p2 }
  0x34   :  { %99 = vadd.xlane.f32.xlu0 %v98_v17  ;;  %v128_v55 = vadd.f32 %v127_v54, %v126_v53  ;;  %v172_v2 = vlaneseq  ;;  %vm206_vm2 = vcmask 1041409   ;;  %vm208_vm3 = vcmask 1042434  }
  0x35   :  { %362 = vmatprep.subr.msk.bf16.mxu0 %vm90_vm1, %v361_v57  ;;  %v296_v59 = vsel %vm90_vm1, %v360_v58, 0  ;;  %vm210_vm4 = vcmask 1043459   ;;  %vm212_vm5 = vcmask 1044484   ;;  %vm214_vm6 = vcmask 1045509   ;;  %p451_p5 = pnand %p450_p4, %p444_p1 }
  0x36   :  { %150 = vadd.xlane.f32.xlu1 %v149_v25  ;;  %316 = vmatpush1.bf16.msra.mxu0 %v296_v59  ;;  %v173_v5 = vand.u32 127, %v172_v2  ;;  %v175_v8 = vshrl.u32 %v172_v2, 7  ;;  %vm216_vm7 = vcmask 1046534   ;;  %vm218_vm8 = vcmask 1047559  }
  0x37   :  { %vm270_vm9 = vcmask 31744   ;;  %vm291_vm10 = vcmask 64512  }
  0x38   :  { %104 = vadd.xlane.f32.xlu0 %v103_v24  ;;  %v229_v9 = vadd.s32 4294967292, %v173_v5  ;;  %v176_v13 = vsub.s32 %v173_v5, %v175_v8  ;;  %v282_v53 = vsub.s32 1, %v175_v8 }
  0x3a   :  { %153 = vadd.xlane.f32.xlu1 %v152_v32  ;;  %v232_v12 = vsub.s32 %v229_v9, %v175_v8 }
  0x3c   :  { %109 = vadd.xlane.f32.xlu0 %v108_v31 }
  0x3e   :  { %156 = vadd.xlane.f32.xlu1 %v155_v39 }
  0x40   :  { %114 = vadd.xlane.f32.xlu0 %v113_v38 }
  0x42   :  { %159 = vadd.xlane.f32.xlu1 %v158_v46 }
  0x44   :  { %119 = vadd.xlane.f32.xlu0 %v118_v45 }
  0x46   :  { %162 = vadd.xlane.f32.xlu1 %v161_v52  ;;  %v274_v52 = vld [vmem:[%s555_s3] sm:$0x3] }
  0x48   :  { %124 = vadd.xlane.f32.xlu0 %v123_v51  ;;  %v278_v51 = vsub.s32 0, %v175_v8 }
  0x4a   :  { %v279_v54 = vrot.slane %v274_v52, %v278_v51 }
  0x4c   :  { %129 = vadd.xlane.f32.xlu0 %v128_v55  ;;  %v283_v55 = vrot.slane %v274_v52, %v282_v53 }
  0xb3   :  { %v142_v61 = vpop.xlane.xlu1 %141 }
  0xb4   :  { %v233_v16 = vrot.slane %v142_v61, %v232_v12 }
  0xb7   :  { %v145_v62 = vpop.xlane.xlu1 %144 }
  0xb8   :  { %v237_v17 = vrot.slane %v145_v62, %v232_v12 }
  0xb9   :  { %v95_v63 = vpop.xlane.xlu0 %94 }
  0xba   :  { %v177_v21 = vrot.slane %v95_v63, %v176_v13  ;;  %v262_v28 = vsel %vm206_vm2, %v237_v17, %v233_v16 }
  0xbb   :  { %v148_v0 = vpop.xlane.xlu1 %147 }
  0xbc   :  { %v241_v19 = vrot.slane %v148_v0, %v232_v12 }
  0xbd   :  { %v100_v1 = vpop.xlane.xlu0 %99 }
  0xbe   :  { %v181_v18 = vrot.slane %v100_v1, %v176_v13  ;;  %v263_v32 = vsel %vm208_vm3, %v241_v19, %v262_v28 }
  0xbf   :  { %v151_v3 = vpop.xlane.xlu1 %150 }
  0xc0   :  { %v245_v22 = vrot.slane %v151_v3, %v232_v12  ;;  %v207_v29 = vsel %vm206_vm2, %v181_v18, %v177_v21 }
  0xc1   :  { %v105_v4 = vpop.xlane.xlu0 %104 }
  0xc2   :  { %v185_v20 = vrot.slane %v105_v4, %v176_v13  ;;  %v264_v36 = vsel %vm210_vm4, %v245_v22, %v263_v32 }
  0xc3   :  { %v154_v6 = vpop.xlane.xlu1 %153 }
  0xc4   :  { %v249_v24 = vrot.slane %v154_v6, %v232_v12  ;;  %v209_v33 = vsel %vm208_vm3, %v185_v20, %v207_v29 }
  0xc5   :  { %v110_v7 = vpop.xlane.xlu0 %109 }
  0xc6   :  { %v189_v23 = vrot.slane %v110_v7, %v176_v13  ;;  %v265_v39 = vsel %vm212_vm5, %v249_v24, %v264_v36 }
  0xc7   :  { %v157_v10 = vpop.xlane.xlu1 %156 }
  0xc8   :  { %v253_v30 = vrot.slane %v157_v10, %v232_v12  ;;  %v211_v37 = vsel %vm210_vm4, %v189_v23, %v209_v33 }
  0xc9   :  { %v115_v11 = vpop.xlane.xlu0 %114 }
  0xca   :  { %v193_v25 = vrot.slane %v115_v11, %v176_v13  ;;  %v266_v42 = vsel %vm214_vm6, %v253_v30, %v265_v39 }
  0xcb   :  { %v160_v14 = vpop.xlane.xlu1 %159 }
  0xcc   :  { %v257_v34 = vrot.slane %v160_v14, %v232_v12  ;;  %v213_v40 = vsel %vm212_vm5, %v193_v25, %v211_v37 }
  0xcd   :  { %v120_v15 = vpop.xlane.xlu0 %119 }
  0xce   :  { %v197_v31 = vrot.slane %v120_v15, %v176_v13  ;;  %v267_v45 = vsel %vm216_vm7, %v257_v34, %v266_v42 }
  0xcf   :  { %v163_v26 = vpop.xlane.xlu1 %162 }
  0xd0   :  { %v261_v38 = vrot.slane %v163_v26, %v232_v12  ;;  %v215_v43 = vsel %vm214_vm6, %v197_v31, %v213_v40 }
  0xd1   :  { %v125_v27 = vpop.xlane.xlu0 %124 }
  0xd2   :  { %v201_v35 = vrot.slane %v125_v27, %v176_v13  ;;  %v268_v47 = vsel %vm218_vm8, %v261_v38, %v267_v45 }
  0xd4   :  { %v217_v46 = vsel %vm216_vm7, %v201_v35, %v215_v43 }
  0xd5   :  { %v130_v41 = vpop.xlane.xlu0 %129 }
  0xd6   :  { %v205_v44 = vrot.slane %v130_v41, %v176_v13 }
  0xd8   :  { %v219_v48 = vsel %vm218_vm8, %v205_v44, %v217_v46 }
  0xd9   :  { %v271_v49 = vsel %vm270_vm9, %v219_v48, %v268_v47 }
  0xda   :  { %v272_v50 = vpack.c.bf16 %v271_v49, %v271_v49 }
  0xdc   :  { %363 = vmatmul.mubr.msk.bf16.vlgmr.msra.gmra.mxu0 %vm291_vm10, %v272_v50 }
 0x19c   :  { %v335_v56 = vpop.f32.mrf.mxu0 }
 0x19d   :  { %v336_v57 = vadd.f32 %v335_v56, %v279_v54 }
 0x19e   :  { %v337_v58 = vpop.f32.mrf.mxu0 }
 0x19f   :  { %342 = vst [vmem:[#allocation8] sm:$0xff] %v336_v57  ;;  %v338_v59 = vadd.f32 %v337_v58, %v283_v55 }
 0x1a0   :  { %v339_v60 = vpop.f32.mrf.mxu0 }
 0x1a1   :  { %343 = vst [vmem:[#allocation8 + $0x8] sm:$0xff] %v338_v59 }
 0x1a2   :  { %v340_v61 = vpop.f32.mrf.mxu0 }
 0x1a3   :  { %454 = shalt.err (!%p451_p5)
}
 0x1a4   :  { %353 = dma.vmem_to_hbm [thread:$0]  %s351_s8, 256, %s556_s4, [#allocation4]  }
 0x1a5   :  { %467 = dma.done.wait [#allocation4], 256  }
 0x1a6   :  { %468 = vsyncadd [#allocation4], 4294967040 }
 0x1a7   :  { %357 = vsyncpa [#allocation3], 1 }
 0x1a8   :  { %358 = vsyncpa [#allocation6], 1 }
 0x1a9   :  { %359 = vsyncpa [#allocation4], 1 }

</bundles_post_ra>
